<compile_context>
chip_gen: v7x
topology: tpu7x:2x2x1
jax: 0.10.0
libtpu: 0.0.40
codegen_flags: <defaults>
</compile_context>

<pallas_src>
import jax
import jax.numpy as jnp
from jax import lax
from jax.experimental import pallas as pl
from jax.experimental.pallas import tpu as pltpu


def multitask_kernel(uid_ref, iid_ref, uet_ref, iet_ref, a_ref, b_ref,
                     w1t_ref, b1_ref, w2_ref, b2_ref, out_ref):
    uid = uid_ref[...]                                    # (1, T) int32
    iid = iid_ref[...]                                    # (1, T) int32
    n_u = uet_ref.shape[1]
    n_i = iet_ref.shape[1]
    t = uid.shape[1]

    # One-hot gather masks (num_rows, T): built on the VPU, consumed by the MXU.
    onehot_u = (lax.broadcasted_iota(jnp.int32, (n_u, t), 0) == uid
                ).astype(jnp.float32)                     # (n_u, T)
    onehot_i = (lax.broadcasted_iota(jnp.int32, (n_i, t), 0) == iid
                ).astype(jnp.float32)                     # (n_i, T)

    # Gather embeddings / biases in transposed (feature-on-sublane) layout.
    u_t = jnp.dot(uet_ref[...], onehot_u, preferred_element_type=jnp.float32)  # (D, T)
    v_t = jnp.dot(iet_ref[...], onehot_i, preferred_element_type=jnp.float32)  # (D, T)
    a_t = jnp.dot(a_ref[...], onehot_u, preferred_element_type=jnp.float32)    # (1, T)
    b_t = jnp.dot(b_ref[...], onehot_i, preferred_element_type=jnp.float32)    # (1, T)

    # predictions p_ij = sum_k u_k v_k + a_i + b_j
    prod_t = u_t * v_t                                    # (D, T)
    pred = jnp.sum(prod_t, axis=0, keepdims=True) + a_t + b_t                  # (1, T)

    # Linear(3D -> H): single merged K=96 MXU matmul in transposed layout.
    x_t = jnp.concatenate([u_t, v_t, prod_t], axis=0)     # (3D, T), sublane-aligned
    h_t = jnp.dot(w1t_ref[...], x_t, preferred_element_type=jnp.float32)
    h_t = jnp.maximum(h_t + b1_ref[...], 0.0)             # (H, T)

    # Linear(H -> 1): (1,H) x (H,T) -> (1,T)
    score = jnp.dot(w2_ref[...], h_t, preferred_element_type=jnp.float32) + b2_ref[...]

    # Lane-dense output: row 0 = predictions, row 1 = score.
    out_ref[0:1, :] = pred
    out_ref[1:2, :] = score


def _round_up(x, m):
    return (x + m - 1) // m * m


def multitask_forward(user_ids, item_ids, params, tile_b_max=4096):
    """Returns (predictions, score), each of shape (batch,)."""
    # Resident, pre-transposed tables / weights (tiny, one-time layout cost).
    ue_t = params["users_embedding"].T                    # (D, n_u)
    ie_t = params["items_embedding"].T                    # (D, n_i)
    a_row = params["A"].reshape(1, -1)                    # (1, n_u)
    b_row = params["B"].reshape(1, -1)                    # (1, n_i)
    D, n_u = ue_t.shape
    _, n_i = ie_t.shape
    H = params["w1"].shape[1]
    w1_t = params["w1"].T                                 # (H, 3D)
    b1_col = params["b1"].reshape(H, 1)                   # (H, 1)
    w2_row = params["w2"].reshape(1, H)                   # (1, H)
    b2 = params["b2"].reshape(1, 1)                       # (1, 1)

    B = user_ids.shape[0]
    # TILE_B: always a multiple of 128 (lane-dense blocks), capped by batch.
    TILE_B = min(_round_up(max(tile_b_max, 128), 128), _round_up(B, 128))
    B_pad = _round_up(B, TILE_B)

    # Pad only the id streams (4 B/elem); index 0 is a valid row, pad rows are
    # computed and sliced away.
    uid = jnp.pad(user_ids.astype(jnp.int32).reshape(1, B), ((0, 0), (0, B_pad - B)))
    iid = jnp.pad(item_ids.astype(jnp.int32).reshape(1, B), ((0, 0), (0, B_pad - B)))

    grid = (B_pad // TILE_B,)
    id_spec = pl.BlockSpec((1, TILE_B), lambda i: (0, i))
    resident = lambda shape: pl.BlockSpec(shape, lambda i: (0, 0))

    out = pl.pallas_call(
        multitask_kernel,
        out_shape=jax.ShapeDtypeStruct((2, B_pad), jnp.float32),
        grid=grid,
        in_specs=[
            id_spec,                    # user ids  (1, TILE_B)
            id_spec,                    # item ids  (1, TILE_B)
            resident((D, n_u)),         # users_embedding^T
            resident((D, n_i)),         # items_embedding^T
            resident((1, n_u)),         # A (user bias) row
            resident((1, n_i)),         # B (item bias) row
            resident((H, 3 * D)),       # w1^T
            resident((H, 1)),           # b1 column
            resident((1, H)),           # w2 row
            resident((1, 1)),           # b2
        ],
        out_specs=pl.BlockSpec((2, TILE_B), lambda i: (0, i)),
        compiler_params=pltpu.CompilerParams(
            dimension_semantics=("parallel",),
            vmem_limit_bytes=48 * 1024 * 1024),
    )(uid, iid, ue_t, ie_t, a_row, b_row, w1_t, b1_col, w2_row, b2)

    return out[0, :B], out[1, :B]


def init_params(key, num_users, num_items, embedding_dim=32, layer_sizes=(96, 64)):
    """Deterministic parameter init mirroring the PyTorch module's __init__."""
    k = jax.random.split(key, 6)
    d = embedding_dim
    params = {
        # ScaledEmbedding: normal(0, 1/embedding_dim)
        "users_embedding": jax.random.normal(k[0], (num_users, d), jnp.float32) / d,
        "items_embedding": jax.random.normal(k[1], (num_items, d), jnp.float32) / d,
        # ZeroEmbedding: zeros
        "A": jnp.zeros((num_users, 1), jnp.float32),
        "B": jnp.zeros((num_items, 1), jnp.float32),
    }
    # nn.Linear default init: U(-1/sqrt(fan_in), 1/sqrt(fan_in)); stored as (in, out)
    in0, h = layer_sizes[0], layer_sizes[1]
    lim0 = 1.0 / jnp.sqrt(jnp.float32(in0))
    lim1 = 1.0 / jnp.sqrt(jnp.float32(h))
    params["w1"] = jax.random.uniform(k[2], (in0, h), jnp.float32, -lim0, lim0)
    params["b1"] = jax.random.uniform(k[3], (h,), jnp.float32, -lim0, lim0)
    params["w2"] = jax.random.uniform(k[4], (h, 1), jnp.float32, -lim1, lim1)
    params["b2"] = jax.random.uniform(k[5], (1,), jnp.float32, -lim1, lim1)
    return params


def _reference(user_ids, item_ids, params):
    ue = params["users_embedding"][user_ids]
    ie = params["items_embedding"][item_ids]
    prod = ue * ie
    pred = jnp.sum(prod, -1) + params["A"][user_ids][:, 0] + params["B"][item_ids][:, 0]
    x = jnp.concatenate([ue, ie, prod], -1)
    h = jnp.maximum(x @ params["w1"] + params["b1"], 0.0)
    score = (h @ params["w2"] + params["b2"])[:, 0]
    return pred, score


if __name__ == "__main__":
    key = jax.random.PRNGKey(0)
    num_users, num_items, embedding_dim = 100, 200, 32

    pkey, ukey, ikey, ukey2, ikey2 = jax.random.split(key, 5)
    params = init_params(pkey, num_users, num_items, embedding_dim)

    # small demo batch
    batch = 8
    user_ids = jax.random.randint(ukey, (batch,), 0, num_users, jnp.int32)
    item_ids = jax.random.randint(ikey, (batch,), 0, num_items, jnp.int32)

    predictions, score = multitask_forward(user_ids, item_ids, params)
    jax.block_until_ready((predictions, score))

    pred_ref, score_ref = _reference(user_ids, item_ids, params)
    assert predictions.shape == (batch,) and score.shape == (batch,)
    assert jnp.allclose(predictions, pred_ref, atol=1e-5)
    assert jnp.allclose(score, score_ref, atol=1e-5)

    # larger, non-multiple batch + non-multiple-of-128 tile_b_max to exercise
    # the multi-tile grid, id padding, and tile rounding paths.
    batch2 = 300
    user_ids2 = jax.random.randint(ukey2, (batch2,), 0, num_users, jnp.int32)
    item_ids2 = jax.random.randint(ikey2, (batch2,), 0, num_items, jnp.int32)
    pred2, score2 = multitask_forward(user_ids2, item_ids2, params, tile_b_max=100)
    jax.block_until_ready((pred2, score2))
    pred2_ref, score2_ref = _reference(user_ids2, item_ids2, params)
    assert pred2.shape == (batch2,) and score2.shape == (batch2,)
    assert jnp.allclose(pred2, pred2_ref, atol=1e-5)
    assert jnp.allclose(score2, score2_ref, atol=1e-5)

    print("KERNEL_OK")
</pallas_src>

<mosaic_0001>
module attributes {stable_mosaic.version = 11 : i64} {
  func.func @multitask_kernel(%arg0: i32, %arg1: memref<1x128xi32, #tpu.memory_space<vmem>>, %arg2: memref<1x128xi32, #tpu.memory_space<vmem>>, %arg3: memref<32x100xf32, #tpu.memory_space<vmem>>, %arg4: memref<32x200xf32, #tpu.memory_space<vmem>>, %arg5: memref<1x100xf32, #tpu.memory_space<vmem>>, %arg6: memref<1x200xf32, #tpu.memory_space<vmem>>, %arg7: memref<64x96xf32, #tpu.memory_space<vmem>>, %arg8: memref<64x1xf32, #tpu.memory_space<vmem>>, %arg9: memref<1x64xf32, #tpu.memory_space<vmem>>, %arg10: memref<1x1xf32, #tpu.memory_space<vmem>>, %arg11: memref<2x128xf32, #tpu.memory_space<vmem>>) attributes {dimension_semantics = [#tpu.dimension_semantics<parallel>], iteration_bounds = array<i64: 1>, scalar_prefetch = 0 : i64, scratch_operands = 0 : i64, tpu.core_type = #tpu.core_type<tc>, window_params = [{transform_indices = @transform_0, window_bounds = array<i64: 1, 128>}, {transform_indices = @transform_1, window_bounds = array<i64: 1, 128>}, {pipeline_mode = #tpu.pipeline_mode<synchronous>, transform_indices = @transform_2, window_bounds = array<i64: 32, 100>}, {pipeline_mode = #tpu.pipeline_mode<synchronous>, transform_indices = @transform_3, window_bounds = array<i64: 32, 200>}, {pipeline_mode = #tpu.pipeline_mode<synchronous>, transform_indices = @transform_4, window_bounds = array<i64: 1, 100>}, {pipeline_mode = #tpu.pipeline_mode<synchronous>, transform_indices = @transform_5, window_bounds = array<i64: 1, 200>}, {pipeline_mode = #tpu.pipeline_mode<synchronous>, transform_indices = @transform_6, window_bounds = array<i64: 64, 96>}, {pipeline_mode = #tpu.pipeline_mode<synchronous>, transform_indices = @transform_7, window_bounds = array<i64: 64, 1>}, {pipeline_mode = #tpu.pipeline_mode<synchronous>, transform_indices = @transform_8, window_bounds = array<i64: 1, 64>}, {pipeline_mode = #tpu.pipeline_mode<synchronous>, transform_indices = @transform_9, window_bounds = array<i64: 1, 1>}, {transform_indices = @transform_10, window_bounds = array<i64: 2, 128>}]} {
    %c0 = arith.constant 0 : index
    %c0_0 = arith.constant 0 : index
    %0 = vector.load %arg1[%c0, %c0_0] : memref<1x128xi32, #tpu.memory_space<vmem>>, vector<1x128xi32>
    %c0_1 = arith.constant 0 : index
    %c0_2 = arith.constant 0 : index
    %1 = vector.load %arg2[%c0_1, %c0_2] : memref<1x128xi32, #tpu.memory_space<vmem>>, vector<1x128xi32>
    %2 = tpu.iota {dimensions = array<i32: 0>} : vector<100x128xi32>
    %3 = vector.broadcast %0 : vector<1x128xi32> to vector<100x128xi32>
    %4 = arith.cmpi eq, %2, %3 : vector<100x128xi32>
    %5 = arith.extui %4 : vector<100x128xi1> to vector<100x128xi32>
    %6 = arith.sitofp %5 : vector<100x128xi32> to vector<100x128xf32>
    %7 = tpu.iota {dimensions = array<i32: 0>} : vector<200x128xi32>
    %8 = vector.broadcast %1 : vector<1x128xi32> to vector<200x128xi32>
    %9 = arith.cmpi eq, %7, %8 : vector<200x128xi32>
    %10 = arith.extui %9 : vector<200x128xi1> to vector<200x128xi32>
    %11 = arith.sitofp %10 : vector<200x128xi32> to vector<200x128xf32>
    %c0_3 = arith.constant 0 : index
    %c0_4 = arith.constant 0 : index
    %12 = vector.load %arg3[%c0_3, %c0_4] : memref<32x100xf32, #tpu.memory_space<vmem>>, vector<32x100xf32>
    %cst = arith.constant dense<0.000000e+00> : vector<32x128xf32>
    %13 = tpu.matmul %12, %6, %cst {dimension_numbers = #tpu.dot_dimension_numbers<[1], [0], [0], [1], [0, 0, 1, 1], [], []>} : vector<32x100xf32>, vector<100x128xf32>, vector<32x128xf32> -> vector<32x128xf32>
    %c0_5 = arith.constant 0 : index
    %c0_6 = arith.constant 0 : index
    %14 = vector.load %arg4[%c0_5, %c0_6] : memref<32x200xf32, #tpu.memory_space<vmem>>, vector<32x200xf32>
    %cst_7 = arith.constant dense<0.000000e+00> : vector<32x128xf32>
    %15 = tpu.matmul %14, %11, %cst_7 {dimension_numbers = #tpu.dot_dimension_numbers<[1], [0], [0], [1], [0, 0, 1, 1], [], []>} : vector<32x200xf32>, vector<200x128xf32>, vector<32x128xf32> -> vector<32x128xf32>
    %c0_8 = arith.constant 0 : index
    %c0_9 = arith.constant 0 : index
    %16 = vector.load %arg5[%c0_8, %c0_9] : memref<1x100xf32, #tpu.memory_space<vmem>>, vector<1x100xf32>
    %cst_10 = arith.constant dense<0.000000e+00> : vector<1x128xf32>
    %17 = tpu.matmul %16, %6, %cst_10 {dimension_numbers = #tpu.dot_dimension_numbers<[1], [0], [0], [1], [0, 0, 1, 1], [], []>} : vector<1x100xf32>, vector<100x128xf32>, vector<1x128xf32> -> vector<1x128xf32>
    %c0_11 = arith.constant 0 : index
    %c0_12 = arith.constant 0 : index
    %18 = vector.load %arg6[%c0_11, %c0_12] : memref<1x200xf32, #tpu.memory_space<vmem>>, vector<1x200xf32>
    %cst_13 = arith.constant dense<0.000000e+00> : vector<1x128xf32>
    %19 = tpu.matmul %18, %11, %cst_13 {dimension_numbers = #tpu.dot_dimension_numbers<[1], [0], [0], [1], [0, 0, 1, 1], [], []>} : vector<1x200xf32>, vector<200x128xf32>, vector<1x128xf32> -> vector<1x128xf32>
    %20 = arith.mulf %13, %15 : vector<32x128xf32>
    %cst_14 = arith.constant dense<0.000000e+00> : vector<128xf32>
    %21 = vector.multi_reduction <add>, %20, %cst_14 [0] : vector<32x128xf32> to vector<128xf32>
    %22 = vector.shape_cast %21 : vector<128xf32> to vector<1x128xf32>
    %23 = arith.addf %22, %17 : vector<1x128xf32>
    %24 = arith.addf %23, %19 : vector<1x128xf32>
    %25 = tpu.concatenate %13, %15, %20 in 0 : vector<32x128xf32>, vector<32x128xf32>, vector<32x128xf32> -> vector<96x128xf32>
    %c0_15 = arith.constant 0 : index
    %c0_16 = arith.constant 0 : index
    %26 = vector.load %arg7[%c0_15, %c0_16] : memref<64x96xf32, #tpu.memory_space<vmem>>, vector<64x96xf32>
    %cst_17 = arith.constant dense<0.000000e+00> : vector<64x128xf32>
    %27 = tpu.matmul %26, %25, %cst_17 {dimension_numbers = #tpu.dot_dimension_numbers<[1], [0], [0], [1], [0, 0, 1, 1], [], []>} : vector<64x96xf32>, vector<96x128xf32>, vector<64x128xf32> -> vector<64x128xf32>
    %c0_18 = arith.constant 0 : index
    %c0_19 = arith.constant 0 : index
    %28 = vector.load %arg8[%c0_18, %c0_19] : memref<64x1xf32, #tpu.memory_space<vmem>>, vector<64x1xf32>
    %29 = vector.broadcast %28 : vector<64x1xf32> to vector<64x128xf32>
    %30 = arith.addf %27, %29 : vector<64x128xf32>
    %cst_20 = arith.constant 0.000000e+00 : f32
    %31 = vector.broadcast %cst_20 : f32 to vector<64x128xf32>
    %32 = arith.maximumf %30, %31 : vector<64x128xf32>
    %c0_21 = arith.constant 0 : index
    %c0_22 = arith.constant 0 : index
    %33 = vector.load %arg9[%c0_21, %c0_22] : memref<1x64xf32, #tpu.memory_space<vmem>>, vector<1x64xf32>
    %cst_23 = arith.constant dense<0.000000e+00> : vector<1x128xf32>
    %34 = tpu.matmul %33, %32, %cst_23 {dimension_numbers = #tpu.dot_dimension_numbers<[1], [0], [0], [1], [0, 0, 1, 1], [], []>} : vector<1x64xf32>, vector<64x128xf32>, vector<1x128xf32> -> vector<1x128xf32>
    %c0_24 = arith.constant 0 : index
    %c0_25 = arith.constant 0 : index
    %35 = vector.load %arg10[%c0_24, %c0_25] : memref<1x1xf32, #tpu.memory_space<vmem>>, vector<1x1xf32>
    %36 = vector.broadcast %35 : vector<1x1xf32> to vector<1x128xf32>
    %37 = arith.addf %34, %36 : vector<1x128xf32>
    %c0_26 = arith.constant 0 : index
    %c0_27 = arith.constant 0 : index
    %38 = vector.load %arg11[%c0_26, %c0_27] : memref<2x128xf32, #tpu.memory_space<vmem>>, vector<1x128xf32>
    tpu.vector_store %arg11[%c0_26, %c0_27], %24 {strides = array<i32>} : memref<2x128xf32, #tpu.memory_space<vmem>>, vector<1x128xf32>,
    %c1 = arith.constant 1 : index
    %c0_28 = arith.constant 0 : index
    %39 = vector.load %arg11[%c1, %c0_28] : memref<2x128xf32, #tpu.memory_space<vmem>>, vector<1x128xf32>
    tpu.vector_store %arg11[%c1, %c0_28], %37 {strides = array<i32>} : memref<2x128xf32, #tpu.memory_space<vmem>>, vector<1x128xf32>,
    return
  }
  func.func @transform_0(%arg0: i32) -> (i32, i32) {
    %c0_i32 = arith.constant 0 : i32
    %c0_i32_0 = arith.constant 0 : i32
    return %c0_i32, %arg0 : i32, i32
  }
  func.func @transform_1(%arg0: i32) -> (i32, i32) {
    %c0_i32 = arith.constant 0 : i32
    %c0_i32_0 = arith.constant 0 : i32
    return %c0_i32, %arg0 : i32, i32
  }
  func.func @transform_2(%arg0: i32) -> (i32, i32) {
    %c0_i32 = arith.constant 0 : i32
    %c0_i32_0 = arith.constant 0 : i32
    %c0_i32_1 = arith.constant 0 : i32
    return %c0_i32, %c0_i32_0 : i32, i32
  }
  func.func @transform_3(%arg0: i32) -> (i32, i32) {
    %c0_i32 = arith.constant 0 : i32
    %c0_i32_0 = arith.constant 0 : i32
    %c0_i32_1 = arith.constant 0 : i32
    return %c0_i32, %c0_i32_0 : i32, i32
  }
  func.func @transform_4(%arg0: i32) -> (i32, i32) {
    %c0_i32 = arith.constant 0 : i32
    %c0_i32_0 = arith.constant 0 : i32
    %c0_i32_1 = arith.constant 0 : i32
    return %c0_i32, %c0_i32_0 : i32, i32
  }
  func.func @transform_5(%arg0: i32) -> (i32, i32) {
    %c0_i32 = arith.constant 0 : i32
    %c0_i32_0 = arith.constant 0 : i32
    %c0_i32_1 = arith.constant 0 : i32
    return %c0_i32, %c0_i32_0 : i32, i32
  }
  func.func @transform_6(%arg0: i32) -> (i32, i32) {
    %c0_i32 = arith.constant 0 : i32
    %c0_i32_0 = arith.constant 0 : i32
    %c0_i32_1 = arith.constant 0 : i32
    return %c0_i32, %c0_i32_0 : i32, i32
  }
  func.func @transform_7(%arg0: i32) -> (i32, i32) {
    %c0_i32 = arith.constant 0 : i32
    %c0_i32_0 = arith.constant 0 : i32
    %c0_i32_1 = arith.constant 0 : i32
    return %c0_i32, %c0_i32_0 : i32, i32
  }
  func.func @transform_8(%arg0: i32) -> (i32, i32) {
    %c0_i32 = arith.constant 0 : i32
    %c0_i32_0 = arith.constant 0 : i32
    %c0_i32_1 = arith.constant 0 : i32
    return %c0_i32, %c0_i32_0 : i32, i32
  }
  func.func @transform_9(%arg0: i32) -> (i32, i32) {
    %c0_i32 = arith.constant 0 : i32
    %c0_i32_0 = arith.constant 0 : i32
    %c0_i32_1 = arith.constant 0 : i32
    return %c0_i32, %c0_i32_0 : i32, i32
  }
  func.func @transform_10(%arg0: i32) -> (i32, i32) {
    %c0_i32 = arith.constant 0 : i32
    %c0_i32_0 = arith.constant 0 : i32
    return %c0_i32, %arg0 : i32, i32
  }
}

</mosaic_0001>

<bundles_post_ra>
// kernel: tpu_custom_call.1
= control target key start
LH: loop header
LB: loop body
LE: loop exit
PB: predicated region body
PF: predicated region fallthrough
CT: control target
= control target key end

     0   :  { %s1962_s0 = inlined_call_operand.vmem [shape: s32[1,128], index: 0, kind: input, shape index: {}]   ;;  %s1963_s1 = inlined_call_operand.vmem [shape: s32[1,128], index: 1, kind: input, shape index: {}]   ;;  %s1964_s2 = inlined_call_operand.hbm [shape: f32[32,100], index: 2, kind: input, shape index: {}]   ;;  %s1965_s3 = inlined_call_operand.vmem [shape: f32[32,200], index: 3, kind: input, shape index: {}]   ;;  %s1966_s4 = inlined_call_operand.vmem [shape: f32[1,100], index: 4, kind: input, shape index: {}]   ;;  %s1967_s5 = inlined_call_operand.vmem [shape: f32[1,200], index: 5, kind: input, shape index: {}]   ;;  %s1968_s6 = inlined_call_operand.hbm [shape: f32[64,96], index: 6, kind: input, shape index: {}]   ;;  %s1969_s7 = inlined_call_operand.vmem [shape: f32[64,1], index: 7, kind: input, shape index: {}]   ;;  %s1970_s8 = inlined_call_operand.vmem [shape: f32[1,64], index: 8, kind: input, shape index: {}]   ;;  %s1971_s9 = inlined_call_operand.<no memory space> [shape: f32[1,1], index: 9, kind: input, shape index: {}]   ;;  %s1972_s10 = inlined_call_operand.hbm [shape: f32[2,128], index: 10, kind: output, shape index: {}]  }
   0x1   :  { %v15_v0 = vstv %s1971_s9 }
   0x2   :  { %16 = vst [vmem:[#allocation2] sm:$0x1] %v15_v0 }
   0x3   :  { %17 = vsyncpa [#allocation4], 0 }
   0x4   :  { %18 = vsyncpa [#allocation7], 0 }
   0x5   :  { %19 = vsyncpa [#allocation5], 0  ;;  %s1446_s15 = smov [#allocation3]   ;;  %s1374_s19 = scalar_lea.hbm %s1964_s2, 512 }
   0x6   :  { %s29_s16 = sshll.u32 %s1446_s15, 4  ;;  %p1375_p0 = scmp.ne.s32.totalorder %s1964_s2, %s1374_s19  ;;  %s30_s16 = int_to_ptr.vmem [resolvable:$true] %s29_s16 }
   0x7   :  { %p1378_p1 = scmp.lt.u32.totalorder %s1374_s19, %s1964_s2 }
   0x9   :  { %p1380_p2 = pnand %p1378_p1, %p1375_p0 }
   0xb   :  { %1383 = shalt.err (!%p1380_p2)
}
   0xc   :  { %s1384_s9 = scalar_lea.vmem %s30_s16, 512  ;;  %p1389_p4 = scmp.lt.s32.totalorder %s30_s16, %s30_s16 }
   0xd   :  { %p1385_p3 = scmp.ne.s32.totalorder %s30_s16, %s1384_s9  ;;  %p1390_p5 = scmp.lt.s32.totalorder %s1384_s9, %s1384_s9 }
   0xf   :  { %p1391_p6 = por %p1390_p5, %p1389_p4 }
  0x11   :  { %p1392_p7 = pnand %p1391_p6, %p1385_p3 }
  0x13   :  { %1395 = shalt.err (!%p1392_p7)
}
  0x14   :  { %s1447_s24 = smov 128   ;;  %s1448_s25 = smov 8  }
  0x15   :  { %35 = dma.hbm_to_vmem [thread:$0]  %s1964_s2, 512, %s30_s16, [#allocation4], %s1447_s24, %s1447_s24, %s1448_s25  }
  0x16   :  { %s1449_s28 = smov [#allocation6]   ;;  %s1396_s12 = scalar_lea.hbm %s1968_s6, 1024 }
  0x17   :  { %s47_s29 = sshll.u32 %s1449_s28, 4  ;;  %p1397_p8 = scmp.ne.s32.totalorder %s1968_s6, %s1396_s12  ;;  %s48_s29 = int_to_ptr.vmem [resolvable:$true] %s47_s29 }
  0x18   :  { %p1400_p9 = scmp.lt.u32.totalorder %s1396_s12, %s1968_s6 }
  0x1a   :  { %p1402_p10 = pnand %p1400_p9, %p1397_p8 }
  0x1c   :  { %1405 = shalt.err (!%p1402_p10)
}
  0x1d   :  { %s1406_s18 = scalar_lea.vmem %s48_s29, 1024  ;;  %p1411_p12 = scmp.lt.s32.totalorder %s48_s29, %s48_s29 }
  0x1e   :  { %p1407_p11 = scmp.ne.s32.totalorder %s48_s29, %s1406_s18  ;;  %p1412_p13 = scmp.lt.s32.totalorder %s1406_s18, %s1406_s18 }
  0x20   :  { %p1413_p0 = por %p1412_p13, %p1411_p12 }
  0x22   :  { %p1414_p1 = pnand %p1413_p0, %p1407_p11 }
  0x24   :  { %1417 = shalt.err (!%p1414_p1)
}
  0x25   :  { %53 = dma.hbm_to_vmem [thread:$0]  %s1968_s6, 1024, %s48_s29, [#allocation7], %s1447_s24, %s1447_s24, %s1448_s25  }
  0x26   :  { %1440 = dma.done.wait [#allocation4], 512  }
  0x27   :  { %1441 = vsyncadd [#allocation4], 4294966784 }
  0x28   :  { %1442 = dma.done.wait [#allocation7], 1024  }
  0x29   :  { %1443 = vsyncadd [#allocation7], 4294966272  ;;  %v68_v1 = vlaneseq  ;;  %v1450_v2 = vmov 0.0|0.0   ;;  %vm1974_vm0 = vcmask 818176   ;;  %v1550_v9 = vld [vmem:[%s1962_s0] ss:$0 sm:$0xff] }
  0x2a   :  { %1232 = vmatprep.subr.bf16.mxu1 %v1450_v2  ;;  %v1555_v10 = vld [vmem:[%s1963_s1] ss:$0 sm:$0xff]  ;;  %v216_v11 = vld [vmem:[#allocation3] sm:$0xff]  ;;  %vm1973_vm1 = vcmask 588800   ;;  %v1451_v13 = vmov 1.0|1.0  }
  0x2b   :  { %v1540_v3 = vshrl.u32 %v68_v1, 7  ;;  %1118 = vmatprep.mubr.msk.f32.mxu0 %vm1974_vm0, %v216_v11  ;;  %v323_v17 = vld [vmem:[%s1965_s3 + $0x8] sm:$0xff]  ;;  %v1990_v23 = vmov 0  ;;  %v1994_v27 = vmov 0  ;;  %v2002_v33 = vmov 0  ;;  %v218_v42 = vld [vmem:[#allocation3 + $0x10] sm:$0xff] }
  0x2c   :  { %979 = vmatprep.mubr.msk.f32.mxu1 %vm1973_vm1, %v323_v17  ;;  %v1452_v35 = vmov 0.0   ;;  %v2004_v38 = vmov 0  ;;  %v217_v39 = vld [vmem:[#allocation3 + $0x8] sm:$0xff]  ;;  %v219_v46 = vld [vmem:[#allocation3 + $0x18] sm:$0xff]  ;;  %v1454_v60 = vmov 1.0   ;;  %v1455_v12 = vmov 0  }
  0x2d   :  { %v70_v4 = vadd.s32 8, %v1540_v3  ;;  %v71_v5 = vadd.s32 16, %v1540_v3  ;;  %v72_v6 = vadd.s32 24, %v1540_v3  ;;  %v73_v7 = vadd.s32 32, %v1540_v3  ;;  %v502_v57 = vld [vmem:[%s1967_s5] sm:$0x3]  ;;  %1372 = vset.pattern.permute.xlu0 %v1455_v12  ;;  %1373 = vset.pattern.permute.xlu1 %v1455_v12 }
  0x2e   :  { %v74_v8 = vadd.s32 40, %v1540_v3  ;;  %vm86_vm2 = vcmp.eq.s32.totalorder %v1540_v3, %v1550_v9  ;;  %vm141_vm4 = vcmp.eq.s32.totalorder %v1540_v3, %v1555_v10  ;;  %v75_v15 = vadd.s32 48, %v1540_v3  ;;  %v322_v58 = vld [vmem:[%s1965_s3] sm:$0xff]  ;;  %v325_v59 = vld [vmem:[%s1965_s3 + $0x18] sm:$0xff]  ;;  %v324_v63 = vld [vmem:[%s1965_s3 + $0x10] sm:$0xff]  ;;  %s1456_s5 = smov [#allocation8]  }
  0x2f   :  { %vm87_vm3 = vcmp.eq.s32.totalorder %v70_v4, %v1550_v9  ;;  %vm142_vm5 = vcmp.eq.s32.totalorder %v70_v4, %v1555_v10  ;;  %vm88_vm7 = vcmp.eq.s32.totalorder %v71_v5, %v1550_v9  ;;  %vm89_vm8 = vcmp.eq.s32.totalorder %v72_v6, %v1550_v9  ;;  %v428_v61 = vld [vmem:[%s1966_s4] sm:$0x1]  ;;  %v327_v0 = vld [vmem:[%s1965_s3 + $0x28] sm:$0xff]  ;;  %v329_v4 = vld [vmem:[%s1965_s3 + $0x38] sm:$0xff]  ;;  %s887_s28 = sshll.u32 %s1456_s5, 4  ;;  %s888_s28 = int_to_ptr.vmem [resolvable:$true] %s887_s28 }
  0x30   :  { %vm1564_vm6 = vmpackc.low %vm87_vm3, %vm86_vm2  ;;  %vm143_vm9 = vcmp.eq.s32.totalorder %v71_v5, %v1555_v10  ;;  %vm144_vm10 = vcmp.eq.s32.totalorder %v72_v6, %v1555_v10  ;;  %vm90_vm12 = vcmp.eq.s32.totalorder %v73_v7, %v1550_v9  ;;  %vm91_vm13 = vcmp.eq.s32.totalorder %v74_v8, %v1550_v9  ;;  %v326_v1 = vld [vmem:[%s1965_s3 + $0x20] sm:$0xff]  ;;  %v328_v5 = vld [vmem:[%s1965_s3 + $0x30] sm:$0xff]  ;;  %s1418_s29 = scalar_lea.vmem %s888_s28, 32  ;;  %p1423_p3 = scmp.lt.s32.totalorder %s888_s28, %s888_s28 }
  0x31   :  { %1209 = vmatprep.subr.msk.bf16.mxu0 %vm1564_vm6, %v1451_v13  ;;  %vm1575_vm11 = vmpackc.low %vm142_vm5, %vm141_vm4  ;;  %v76_v16 = vadd.s32 56, %v1540_v3  ;;  %vm145_vm3 = vcmp.eq.s32.totalorder %v73_v7, %v1555_v10  ;;  %vm146_vm4 = vcmp.eq.s32.totalorder %v74_v8, %v1555_v10  ;;  %vm92_vm5 = vcmp.eq.s32.totalorder %v75_v15, %v1550_v9  ;;  %v600_v8 = vld [vmem:[#allocation6] sm:$0xff]  ;;  %v610_v11 = vld [vmem:[%s1969_s7 + $0x10] sm:$0xff]  ;;  %p1419_p2 = scmp.ne.s32.totalorder %s888_s28, %s1418_s29  ;;  %p1424_p4 = scmp.lt.s32.totalorder %s1418_s29, %s1418_s29 }
  0x32   :  { %1234 = vmatpush1.bf16.msk.msra.mxu1 %vm1575_vm11, %v1451_v13  ;;  %1211 = vmatpush3.bf16.msk.msra.mxu0 %vm1564_vm6, %v1451_v13  ;;  %vm1592_vm14 = vmpackc.low %vm89_vm8, %vm88_vm7  ;;  %v77_v21 = vadd.s32 64, %v1540_v3  ;;  %v78_v22 = vadd.s32 72, %v1540_v3  ;;  %v79_v25 = vadd.s32 80, %v1540_v3  ;;  %v80_v26 = vadd.s32 88, %v1540_v3  ;;  %v612_v14 = vld [vmem:[%s1969_s7 + $0x20] sm:$0xff]  ;;  %v615_v17 = vld [vmem:[%s1969_s7 + $0x38] sm:$0xff] }
  0x33   :  { %1235 = vmatprep.subr.bf16.mxu1 %v1450_v2  ;;  %1213 = vmatprep.subr.msk.bf16.mxu0 %vm1592_vm14, %v1451_v13  ;;  %vm1602_vm15 = vmpackc.low %vm144_vm10, %vm143_vm9  ;;  %vm93_vm7 = vcmp.eq.s32.totalorder %v76_v16, %v1550_v9  ;;  %vm147_vm10 = vcmp.eq.s32.totalorder %v75_v15, %v1555_v10  ;;  %v81_v29 = vadd.s32 96, %v1540_v3  ;;  %v125_v32 = vadd.s32 104, %v1540_v3  ;;  %v613_v15 = vld [vmem:[%s1969_s7 + $0x28] sm:$0xff]  ;;  %v795_v18 = vld [vmem:[#allocation2] sm:$0x1]  ;;  %p1425_p5 = por %p1424_p4, %p1423_p3 }
  0x34   :  { %vm1606_vm2 = vmpackc.low %vm91_vm13, %vm90_vm12  ;;  %vm148_vm12 = vcmp.eq.s32.totalorder %v76_v16, %v1555_v10  ;;  %vm94_vm13 = vcmp.eq.s32.totalorder %v77_v21, %v1550_v9  ;;  %vm95_vm1 = vcmp.eq.s32.totalorder %v78_v22, %v1550_v9  ;;  %vm96_vm0 = vcmp.eq.s32.totalorder %v79_v25, %v1550_v9  ;;  %628 = vperm.xlu1 %1373, %v610_v11   ;;  %v614_v16 = vld [vmem:[%s1969_s7 + $0x30] sm:$0xff]  ;;  %v603_v47 = vld [vmem:[#allocation6 + $0x18] sm:$0xff] }
  0x35   :  { %vm1627_vm8 = vmpackc.low %vm146_vm4, %vm145_vm3  ;;  %v126_v34 = vadd.s32 112, %v1540_v3  ;;  %v127_v37 = vadd.s32 120, %v1540_v3  ;;  %v128_v40 = vadd.s32 128, %v1540_v3  ;;  %v129_v41 = vadd.s32 136, %v1540_v3  ;;  %v605_v50 = vld [vmem:[#allocation6 + $0x28] sm:$0xff]  ;;  %v607_v53 = vld [vmem:[#allocation6 + $0x38] sm:$0xff]  ;;  %p1426_p6 = pnand %p1425_p5, %p1419_p2 }
  0x36   :  { %1237 = vmatpush1.bf16.msk.msra.mxu1 %vm1602_vm15, %v1451_v13  ;;  %1215 = vmatpush3.bf16.msk.msra.mxu0 %vm1592_vm14, %v1451_v13  ;;  %v1991_v23 = vsel %vm1627_vm8, 4294967295, %v1990_v23  ;;  %vm1631_vm9 = vmpackc.low %vm93_vm7, %vm92_vm5  ;;  %vm149_vm5 = vcmp.eq.s32.totalorder %v77_v21, %v1555_v10  ;;  %vm150_vm7 = vcmp.eq.s32.totalorder %v78_v22, %v1555_v10  ;;  %v130_v44 = vadd.s32 144, %v1540_v3 }
  0x37   :  { %1238 = vmatprep.subr.bf16.mxu1 %v1450_v2  ;;  %1217 = vmatprep.subr.msk.bf16.mxu0 %vm1606_vm2, %v1451_v13  ;;  %vm1651_vm3 = vmpackc.low %vm148_vm12, %vm147_vm10  ;;  %vm151_vm12 = vcmp.eq.s32.totalorder %v79_v25, %v1555_v10  ;;  %v131_v45 = vadd.s32 152, %v1540_v3  ;;  %v132_v48 = vadd.s32 160, %v1540_v3  ;;  %v133_v49 = vadd.s32 168, %v1540_v3 }
  0x38   :  { %v1995_v27 = vsel %vm1651_vm3, 4294967295, %v1994_v27  ;;  %vm1655_vm4 = vmpackc.low %vm95_vm1, %vm94_vm13  ;;  %vm152_vm13 = vcmp.eq.s32.totalorder %v80_v26, %v1555_v10  ;;  %v134_v51 = vadd.s32 176, %v1540_v3  ;;  %v135_v52 = vadd.s32 184, %v1540_v3 }
  0x39   :  { %vm1674_vm1 = vmpackc.low %vm150_vm7, %vm149_vm5  ;;  %vm153_vm5 = vcmp.eq.s32.totalorder %v81_v29, %v1555_v10  ;;  %vm154_vm7 = vcmp.eq.s32.totalorder %v125_v32, %v1555_v10  ;;  %v136_v55 = vadd.s32 192, %v1540_v3  ;;  %v510_v56 = vsub.s32 1, %v1540_v3 }
  0x3a   :  { %1240 = vmatpush1.bf16.msk.msra.mxu1 %vm1627_vm8, %v1451_v13  ;;  %1219 = vmatpush3.bf16.msk.msra.mxu0 %vm1606_vm2, %v1451_v13  ;;  %vm97_vm8 = vcmp.eq.s32.totalorder %v80_v26, %v1550_v9  ;;  %v506_v6 = vsub.s32 0, %v1540_v3 }
  0x3b   :  { %1241 = vmatprep.subr.bf16.mxu1 %v1450_v2  ;;  %1221 = vmatprep.subr.msk.bf16.mxu0 %vm1631_vm9, %v1451_v13  ;;  %vm1678_vm10 = vmpackc.low %vm97_vm8, %vm96_vm0  ;;  %vm1979_vm8 = vcmask 1043456   ;;  %v511_v62 = vrot.slane %v502_v57, %v510_v56 }
  0x3c   :  { %vm1696_vm0 = vmpackc.low %vm152_vm13, %vm151_vm12  ;;  %vm155_vm12 = vcmp.eq.s32.totalorder %v126_v34, %v1555_v10  ;;  %vm156_vm13 = vcmp.eq.s32.totalorder %v127_v37, %v1555_v10  ;;  %v507_v7 = vrot.slane %v502_v57, %v506_v6 }
  0x3d   :  { %v2003_v33 = vsel %vm1696_vm0, 4294967295, %v2002_v33 }
  0x3e   :  { %1243 = vmatpush1.bf16.msk.msra.mxu1 %vm1651_vm3, %v1451_v13  ;;  %1223 = vmatpush3.bf16.msk.msra.mxu0 %vm1631_vm9, %v1451_v13  ;;  %vm98_vm3 = vcmp.eq.s32.totalorder %v81_v29, %v1550_v9  ;;  %v608_v9 = vld [vmem:[%s1969_s7] sm:$0xff] }
  0x3f   :  { %1244 = vmatprep.subr.bf16.mxu1 %v1450_v2  ;;  %1225 = vmatprep.subr.msk.bf16.mxu0 %vm1655_vm4, %v1451_v13  ;;  %v1702_v36 = vsel %vm98_vm3, 1.0, %v1452_v35  ;;  %vm1716_vm3 = vmpackc.low %vm154_vm7, %vm153_vm5  ;;  %vm2006_vm5 = vcmask 818176  }
  0x40   :  { %v2005_v38 = vsel %vm1716_vm3, 4294967295, %v2004_v38  ;;  %vm1731_vm7 = vmpackc.low %vm156_vm13, %vm155_vm12  ;;  %618 = vperm.xlu0 %1372, %v608_v9  }
  0x41   :  { %vm2009_vm12 = vmmov %vm2006_vm5 }
  0x42   :  { %1246 = vmatpush1.bf16.msk.msra.mxu1 %vm1674_vm1, %v1451_v13  ;;  %1227 = vmatpush3.bf16.msk.msra.mxu0 %vm1655_vm4, %v1451_v13  ;;  %vm2012_vm13 = vmmov %vm2006_vm5 }
  0x43   :  { %1247 = vmatprep.subr.bf16.mxu1 %v1450_v2  ;;  %1229 = vmatprep.subr.msk.bf16.mxu0 %vm1678_vm10, %v1451_v13 }
  0x46   :  { %1249 = vmatpush1.bf16.msk.msra.mxu1 %vm1696_vm0, %v1451_v13  ;;  %1231 = vmatpush3.bf16.msk.msra.mxu0 %vm1678_vm10, %v1451_v13  ;;  %vm158_vm0 = vcmp.eq.s32.totalorder %v129_v41, %v1555_v10 }
  0x47   :  { %1250 = vmatprep.subr.bf16.mxu1 %v1450_v2  ;;  %1116 = vmatprep.subr.msk.mxu0 %vm1979_vm8, %v1702_v36 }
  0x4a   :  { %1252 = vmatpush1.bf16.msk.msra.mxu1 %vm1716_vm3, %v1451_v13  ;;  %1117 = vmatpush3.msk.msra.mxu0 %vm1979_vm8, %v1702_v36  ;;  %vm157_vm3 = vcmp.eq.s32.totalorder %v128_v40, %v1555_v10  ;;  %vm1453_vm8 = vmmov 0  }
  0x4b   :  { %1268 = vmatprep.subr.bf16.mxu0 %v1450_v2  ;;  %1119 = vmatmul.mubr.msk.f32.vlgmr.msra.gmra.mrb[0].mxu0 %vm2006_vm5, %v217_v39  ;;  %vm159_vm5 = vcmp.eq.s32.totalorder %v130_v44, %v1555_v10 }
  0x4c   :  { %1253 = vmatprep.subr.bf16.mxu1 %v1450_v2  ;;  %1270 = vmatpush3.bf16.msk.msra.mxu0 %vm1564_vm6, %v1451_v13  ;;  %vm1749_vm6 = vmpackc.low %vm158_vm0, %vm157_vm3  ;;  %vm161_vm0 = vcmp.eq.s32.totalorder %v132_v48, %v1555_v10  ;;  %vm162_vm3 = vcmp.eq.s32.totalorder %v133_v49, %v1555_v10  ;;  %v604_v48 = vld [vmem:[#allocation6 + $0x20] sm:$0xff] }
  0x4d   :  { %1271 = vmatprep.subr.bf16.mxu0 %v1450_v2  ;;  %1121 = vmatprep.mubr.msk.f32.mxu0 %vm2009_vm12, %v218_v42  ;;  %vm160_vm12 = vcmp.eq.s32.totalorder %v131_v45, %v1555_v10  ;;  %v601_v45 = vld [vmem:[#allocation6 + $0x8] sm:$0xff] }
  0x4e   :  { %1255 = vmatpush1.bf16.msk.msra.mxu1 %vm1731_vm7, %v1451_v13 }
  0x4f   :  { %1256 = vmatprep.subr.bf16.mxu1 %v1450_v2  ;;  %1122 = vmatmul.mubr.msk.f32.gmra.mrb[2].mxu0 %vm2012_vm13, %v219_v46  ;;  %vm1784_vm13 = vmpackc.low %vm162_vm3, %vm161_vm0  ;;  %vm2021_vm0 = vcmask 818176   ;;  %v602_v46 = vld [vmem:[#allocation6 + $0x10] sm:$0xff] }
  0x50   :  { %1273 = vmatpush3.bf16.msk.msra.mxu0 %vm1592_vm14, %v1451_v13  ;;  %1150 = vmatprep.mubr.msk.f32.mxu0 %vm1453_vm8, %v1452_v35  ;;  %vm1768_vm14 = vmpackc.low %vm160_vm12, %vm159_vm5  ;;  %vm164_vm5 = vcmp.eq.s32.totalorder %v135_v52, %v1555_v10 }
  0x51   :  { %1274 = vmatprep.subr.bf16.mxu0 %v1450_v2 }
  0x52   :  { %1258 = vmatpush1.bf16.msk.msra.mxu1 %vm1749_vm6, %v1451_v13 }
  0x53   :  { %1259 = vmatprep.subr.bf16.mxu1 %v1450_v2 }
  0x54   :  { %1276 = vmatpush3.bf16.msk.msra.mxu0 %vm1606_vm2, %v1451_v13  ;;  %vm163_vm2 = vcmp.eq.s32.totalorder %v134_v51, %v1555_v10  ;;  %v606_v51 = vld [vmem:[#allocation6 + $0x30] sm:$0xff] }
  0x55   :  { %1277 = vmatprep.subr.bf16.mxu0 %v1450_v2  ;;  %vm1798_vm12 = vmpackc.low %vm164_vm5, %vm163_vm2  ;;  %vm2025_vm5 = vnez %v1991_v23 }
  0x56   :  { %1261 = vmatpush1.bf16.msk.msra.mxu1 %vm1768_vm14, %v1451_v13 }
  0x57   :  { %1262 = vmatprep.subr.bf16.mxu1 %v1450_v2 }
  0x58   :  { %1279 = vmatpush3.bf16.msk.msra.mxu0 %vm1631_vm9, %v1451_v13  ;;  %vm165_vm9 = vcmp.eq.s32.totalorder %v136_v55, %v1555_v10  ;;  %v609_v10 = vld [vmem:[%s1969_s7 + $0x8] sm:$0xff] }
  0x59   :  { %1280 = vmatprep.subr.bf16.mxu0 %v1450_v2  ;;  %623 = vperm.xlu0 %1372, %v609_v10  }
  0x5a   :  { %1264 = vmatpush1.bf16.msk.msra.mxu1 %vm1784_vm13, %v1451_v13 }
  0x5b   :  { %1265 = vmatprep.subr.bf16.mxu1 %v1450_v2 }
  0x5c   :  { %1282 = vmatpush3.bf16.msk.msra.mxu0 %vm1655_vm4, %v1451_v13  ;;  %vm2019_vm4 = vcmask 1043456  }
  0x5d   :  { %1283 = vmatprep.subr.bf16.mxu0 %v1450_v2  ;;  %638 = vperm.xlu0 %1372, %v612_v14  }
  0x5e   :  { %1267 = vmatpush1.bf16.msk.msra.mxu1 %vm1798_vm12, %v1451_v13 }
  0x5f   :  { %391 = vmatprep.subr.mxu1 %v1452_v35 }
  0x60   :  { %1285 = vmatpush3.bf16.msk.msra.mxu0 %vm1678_vm10, %v1451_v13  ;;  %vm2020_vm10 = vcmask 588800  }
  0x61   :  { %1148 = vmatprep.subr.mxu0 %v1452_v35  ;;  %vm2022_vm3 = vmmov %vm2020_vm10  ;;  %648 = vperm.xlu0 %1372, %v614_v16  }
  0x62   :  { %978 = vmatpush1.msk.msra.mxu1 %vm165_vm9, %v1454_v60  ;;  %vm2023_vm2 = vmmov %vm2022_vm3 }
  0x63   :  { %408 = vmatmul.mubr.f32.vlgmr.msra.gmra.mrb[0].mxu1 %v322_v58 }
  0x64   :  { %1149 = vmatpush3.msk.msra.mxu0 %vm2019_vm4, %v1702_v36  ;;  %980 = vmatprep.mubr.msk.f32.mxu1 %vm2020_vm10, %v325_v59  ;;  %vm2026_vm4 = vnez %v1995_v27  ;;  %vm2028_vm10 = vnez %v2005_v38 }
  0x65   :  { %1286 = vmatprep.subr.bf16.mxu0 %v1450_v2  ;;  %1151 = vmatmul.mubr.msk.f32.vlgmr.msra.gmra.mrb[4].mxu0 %vm2021_vm0, %v428_v61 }
  0x66   :  { %1288 = vmatpush1.bf16.msk.msra.mxu0 %vm1575_vm11, %v1451_v13  ;;  %1022 = vmatprep.mubr.msk.f32.mxu0 %vm2022_vm3, %v511_v62  ;;  %vm2024_vm11 = vmmov %vm2023_vm2 }
  0x67   :  { %413 = vmatmul.mubr.f32.gmra.mrb[2].mxu1 %v324_v63  ;;  %1289 = vmatprep.subr.bf16.mxu0 %v1450_v2 }
  0x68   :  { %981 = vmatprep.mubr.msk.f32.mxu1 %vm2023_vm2, %v327_v0  ;;  %798 = vperm.xlu0 %1372, %v795_v18  }
  0x6a   :  { %1291 = vmatpush1.bf16.msk.msra.mxu0 %vm1602_vm15, %v1451_v13  ;;  %vm2027_vm15 = vnez %v2003_v33 }
  0x6b   :  { %418 = vmatmul.mubr.f32.gmra.mrb[4].mxu1 %v326_v1  ;;  %1292 = vmatprep.subr.bf16.mxu0 %v1450_v2 }
  0x6c   :  { %982 = vmatprep.mubr.msk.f32.mxu1 %vm2024_vm11, %v329_v4 }
  0x6e   :  { %1294 = vmatpush1.bf16.msk.msra.mxu0 %vm2025_vm5, %v1451_v13 }
  0x6f   :  { %423 = vmatmul.mubr.f32.gmra.mrb[6].mxu1 %v328_v5  ;;  %1295 = vmatprep.subr.bf16.mxu0 %v1450_v2 }
  0x72   :  { %1297 = vmatpush1.bf16.msk.msra.mxu0 %vm2026_vm4, %v1451_v13 }
  0x73   :  { %1298 = vmatprep.subr.bf16.mxu0 %v1450_v2 }
  0x76   :  { %1300 = vmatpush1.bf16.msk.msra.mxu0 %vm1674_vm1, %v1451_v13  ;;  %vm656_vm1 = vcmask 785408  }
  0x77   :  { %1301 = vmatprep.subr.bf16.mxu0 %v1450_v2  ;;  %1177 = vmatprep.mubr.msk.f32.mxu1 %vm656_vm1, %v600_v8 }
  0x7a   :  { %1303 = vmatpush1.bf16.msk.msra.mxu0 %vm2027_vm15, %v1451_v13 }
  0x7b   :  { %1304 = vmatprep.subr.bf16.mxu0 %v1450_v2 }
  0x7e   :  { %1306 = vmatpush1.bf16.msk.msra.mxu0 %vm2028_vm10, %v1451_v13 }
  0x7f   :  { %1307 = vmatprep.subr.bf16.mxu0 %v1450_v2 }
  0x82   :  { %1309 = vmatpush1.bf16.msk.msra.mxu0 %vm1731_vm7, %v1451_v13 }
  0x83   :  { %1310 = vmatprep.subr.bf16.mxu0 %v1450_v2 }
  0x86   :  { %1312 = vmatpush1.bf16.msk.msra.mxu0 %vm1749_vm6, %v1451_v13 }
  0x87   :  { %1313 = vmatprep.subr.bf16.mxu0 %v1450_v2 }
  0x8a   :  { %1315 = vmatpush1.bf16.msk.msra.mxu0 %vm1768_vm14, %v1451_v13 }
  0x8b   :  { %1316 = vmatprep.subr.bf16.mxu0 %v1450_v2 }
  0x8e   :  { %1318 = vmatpush1.bf16.msk.msra.mxu0 %vm1784_vm13, %v1451_v13 }
  0x8f   :  { %1319 = vmatprep.subr.bf16.mxu0 %v1450_v2 }
  0x92   :  { %1321 = vmatpush1.bf16.msk.msra.mxu0 %vm1798_vm12, %v1451_v13  ;;  %v611_v13 = vld [vmem:[%s1969_s7 + $0x18] sm:$0xff] }
  0x93   :  { %563 = vmatprep.subr.mxu0 %v1452_v35  ;;  %633 = vperm.xlu1 %1373, %v611_v13  }
  0x96   :  { %1021 = vmatpush1.msk.msra.mxu0 %vm165_vm9, %v1454_v60 }
  0x97   :  { %580 = vmatmul.mubr.f32.vlgmr.msra.gmra.mrb[4].mxu0 %v507_v7  ;;  %643 = vperm.xlu1 %1373, %v613_v15  }
  0x9b   :  { %653 = vperm.xlu1 %1373, %v615_v17  }
  0xb3   :  { %v629_v62 = vpop.permute.xlu1 %628 }
  0xbf   :  { %v619_v61 = vpop.permute.xlu0 %618 }
  0xd8   :  { %v624_v63 = vpop.permute.xlu0 %623 }
  0xdc   :  { %v639_v15 = vpop.permute.xlu0 %638 }
 0x112   :  { %v634_v0 = vpop.permute.xlu1 %633 }
 0x116   :  { %v644_v10 = vpop.permute.xlu1 %643 }
 0x11e   :  { %v1120_v19 = vpop.f32.mrb[0].mxu0 }
 0x11f   :  { %v303_v20 = vpop.f32.mrb[1].mxu0 }
 0x120   :  { %v1322_v21 = vpack.c.bf16 %v1120_v19, %v303_v20 }
 0x122   :  { %v1123_v22 = vpop.f32.mrb[2].mxu0  ;;  %1323 = vmatprep.subr.bf16.mxu1 %v1322_v21 }
 0x123   :  { %v313_v23 = vpop.f32.mrb[3].mxu0  ;;  %1325 = vmatpush3.bf16.msra.mxu1 %v1322_v21 }
 0x124   :  { %v1326_v24 = vpack.c.bf16 %v1123_v22, %v313_v23 }
 0x126   :  { %1327 = vmatprep.subr.bf16.mxu1 %v1326_v24 }
 0x127   :  { %1329 = vmatpush3.bf16.msra.mxu1 %v1326_v24  ;;  %v654_v24 = vpop.permute.xlu1 %653 }
 0x136   :  { %v409_v25 = vpop.f32.mrb[0].mxu1 }
 0x137   :  { %v585_v26 = vmul.f32 %v409_v25, %v303_v20  ;;  %v411_v27 = vpop.f32.mrb[1].mxu1 }
 0x138   :  { %v649_v27 = vpop.permute.xlu0 %648 }
 0x13a   :  { %v414_v28 = vpop.f32.mrb[2].mxu1 }
 0x13b   :  { %v586_v29 = vmul.f32 %v1120_v19, %v414_v28  ;;  %v1330_v30 = vpack.c.bf16 %v414_v28, %v409_v25  ;;  %v416_v31 = vpop.f32.mrb[3].mxu1 }
 0x13d   :  { %v589_v32 = vadd.f32 %v586_v29, %v585_v26  ;;  %v1338_v33 = vpack.c.bf16 %v586_v29, %v585_v26  ;;  %1331 = vmatprep.subr.bf16.mxu1 %v1330_v30 }
 0x13e   :  { %v419_v34 = vpop.f32.mrb[4].mxu1  ;;  %1333 = vmatpush3.bf16.msra.mxu1 %v1330_v30 }
 0x13f   :  { %v587_v36 = vmul.f32 %v419_v34, %v313_v23  ;;  %v421_v37 = vpop.f32.mrb[5].mxu1 }
 0x140   :  { %v799_v37 = vpop.permute.xlu0 %798 }
 0x141   :  { %v590_v38 = vadd.f32 %v589_v32, %v587_v36 }
 0x142   :  { %v424_v39 = vpop.f32.mrb[6].mxu1 }
 0x143   :  { %v588_v40 = vmul.f32 %v1123_v22, %v424_v39  ;;  %v1334_v41 = vpack.c.bf16 %v424_v39, %v419_v34  ;;  %v426_v42 = vpop.f32.mrb[7].mxu1 }
 0x145   :  { %v591_v43 = vadd.f32 %v590_v38, %v588_v40  ;;  %v1342_v44 = vpack.c.bf16 %v588_v40, %v587_v36  ;;  %1335 = vmatprep.subr.bf16.mxu1 %v1334_v41  ;;  %v794_v36 = vld [vmem:[%s1970_s8] sm:$0x1]  ;;  %v804_v38 = vrot.slane %v799_v37, %v506_v6 }
 0x146   :  { %1337 = vmatpush3.bf16.msra.mxu1 %v1334_v41 }
 0x147   :  { %1339 = vmatprep.subr.bf16.mxu1 %v1338_v33  ;;  %v592_v49 = vrot.slane %v591_v43, 4 }
 0x149   :  { %v593_v52 = vadd.f32 %v592_v49, %v591_v43 }
 0x14a   :  { %1341 = vmatpush3.bf16.msra.mxu1 %v1338_v33 }
 0x14b   :  { %1343 = vmatprep.subr.bf16.mxu1 %v1342_v44  ;;  %v594_v54 = vrot.slane %v593_v52, 2 }
 0x14d   :  { %v595_v55 = vadd.f32 %v594_v54, %v593_v52 }
 0x14e   :  { %1345 = vmatpush3.bf16.msra.mxu1 %v1342_v44 }
 0x14f   :  { %1346 = vmatprep.subr.bf16.mxu1 %v1450_v2  ;;  %v596_v56 = vrot.slane %v595_v55, 1 }
 0x151   :  { %1178 = vmatmul.mubr.msk.f32.vlgmr.msra.gmra.mrb[8].mxu1 %vm656_vm1, %v601_v45  ;;  %v597_v57 = vadd.f32 %v596_v56, %v595_v55 }
 0x152   :  { %1180 = vmatprep.mubr.msk.f32.mxu1 %vm656_vm1, %v602_v46 }
 0x155   :  { %1181 = vmatmul.mubr.msk.f32.gmra.mrb[10].mxu1 %vm656_vm1, %v603_v47 }
 0x156   :  { %1183 = vmatprep.mubr.msk.f32.mxu1 %vm656_vm1, %v604_v48 }
 0x159   :  { %1184 = vmatmul.mubr.msk.f32.gmra.mrb[12].mxu1 %vm656_vm1, %v605_v50 }
 0x15a   :  { %1186 = vmatprep.mubr.msk.f32.mxu1 %vm656_vm1, %v606_v51 }
 0x15d   :  { %1187 = vmatmul.mubr.msk.f32.gmra.mrb[14].mxu1 %vm656_vm1, %v607_v53 }
 0x15e   :  { %1205 = vmatprep.mubr.msk.f32.mxu1 %vm1453_vm8, %v1452_v35  ;;  %vm805_vm8 = vcmask 523264  }
 0x16a   :  { %v581_v58 = vpop.f32.mrb[4].mxu0 }
 0x16b   :  { %v1358_v59 = vadd.f32 %v597_v57, %v581_v58  ;;  %v583_v60 = vpop.f32.mrb[5].mxu0 }
 0x16d   :  { %879 = vst [vmem:[#allocation8] sm:$0x1] %v1358_v59 }
 0x224   :  { %v1179_v1 = vpop.f32.mrb[8].mxu1 }
 0x225   :  { %v753_v4 = vadd.f32 %v1179_v1, %v624_v63  ;;  %v747_v5 = vpop.f32.mrb[9].mxu1 }
 0x226   :  { %v748_v7 = vadd.f32 %v747_v5, %v619_v61 }
 0x227   :  { %v787_v8 = vmax.f32 %v753_v4, 0.0 }
 0x228   :  { %v786_v9 = vmax.f32 %v748_v7, 0.0  ;;  %v1182_v11 = vpop.f32.mrb[10].mxu1 }
 0x229   :  { %v763_v12 = vadd.f32 %v1182_v11, %v634_v0  ;;  %v757_v35 = vpop.f32.mrb[11].mxu1 }
 0x22a   :  { %v1347_v13 = vpack.c.bf16 %v787_v8, %v786_v9  ;;  %v758_v14 = vadd.f32 %v757_v35, %v629_v62 }
 0x22b   :  { %v789_v16 = vmax.f32 %v763_v12, 0.0 }
 0x22c   :  { %v788_v17 = vmax.f32 %v758_v14, 0.0  ;;  %v1185_v18 = vpop.f32.mrb[12].mxu1  ;;  %1348 = vmatpush3.bf16.msra.mxu1 %v1347_v13 }
 0x22d   :  { %v773_v19 = vadd.f32 %v1185_v18, %v644_v10  ;;  %v767_v20 = vpop.f32.mrb[13].mxu1  ;;  %1349 = vmatprep.subr.bf16.mxu1 %v1450_v2 }
 0x22e   :  { %v1350_v21 = vpack.c.bf16 %v789_v16, %v788_v17  ;;  %v768_v22 = vadd.f32 %v767_v20, %v639_v15 }
 0x22f   :  { %v791_v23 = vmax.f32 %v773_v19, 0.0 }
 0x230   :  { %v790_v25 = vmax.f32 %v768_v22, 0.0  ;;  %v1188_v26 = vpop.f32.mrb[14].mxu1  ;;  %1351 = vmatpush3.bf16.msra.mxu1 %v1350_v21 }
 0x231   :  { %v783_v28 = vadd.f32 %v1188_v26, %v654_v24  ;;  %v777_v29 = vpop.f32.mrb[15].mxu1  ;;  %1352 = vmatprep.subr.bf16.mxu1 %v1450_v2 }
 0x232   :  { %v1353_v30 = vpack.c.bf16 %v791_v23, %v790_v25  ;;  %v778_v31 = vadd.f32 %v777_v29, %v649_v27 }
 0x233   :  { %v793_v32 = vmax.f32 %v783_v28, 0.0 }
 0x234   :  { %v792_v33 = vmax.f32 %v778_v31, 0.0  ;;  %1354 = vmatpush3.bf16.msra.mxu1 %v1353_v30 }
 0x235   :  { %1355 = vmatprep.subr.bf16.mxu1 %v1450_v2 }
 0x236   :  { %v1356_v34 = vpack.c.bf16 %v793_v32, %v792_v33 }
 0x238   :  { %1357 = vmatpush3.bf16.msra.mxu1 %v1356_v34 }
 0x23b   :  { %1206 = vmatmul.mubr.msk.f32.vlgmr.msra.gmra.mrb[16].mxu1 %vm805_vm8, %v794_v36 }
 0x30e   :  { %v875_v39 = vpop.f32.mrb[16].mxu1 }
 0x30f   :  { %v876_v40 = vadd.f32 %v875_v39, %v804_v38  ;;  %v1207_v41 = vpop.f32.mrb[17].mxu1 }
 0x311   :  { %880 = vst [vmem:[#allocation8 + $0x1] sm:$0x1] %v876_v40 }
 0x312   :  { %1429 = shalt.err (!%p1426_p6)
}
 0x313   :  { %s1430_s11 = scalar_lea.hbm %s1972_s10, 32 }
 0x314   :  { %p1431_p7 = scmp.ne.s32.totalorder %s1972_s10, %s1430_s11  ;;  %p1434_p8 = scmp.lt.u32.totalorder %s1430_s11, %s1972_s10 }
 0x316   :  { %p1436_p9 = pnand %p1434_p8, %p1431_p7 }
 0x318   :  { %1439 = shalt.err (!%p1436_p9)
}
 0x319   :  { %890 = dma.vmem_to_hbm [thread:$0]  %s888_s28, 32, %s1972_s10, [#allocation5]  }
 0x31a   :  { %1444 = dma.done.wait [#allocation5], 32  }
 0x31b   :  { %1445 = vsyncadd [#allocation5], 4294967264 }
 0x31c   :  { %894 = vsyncpa [#allocation4], 1 }
 0x31d   :  { %895 = vsyncpa [#allocation7], 1 }
 0x31e   :  { %896 = vsyncpa [#allocation5], 1 }

</bundles_post_ra>
